<compile_context>
chip_gen: v7x
topology: tpu7x:2x2x1
jax: 0.10.0
libtpu: 0.0.40
codegen_flags: <defaults>
</compile_context>

<pallas_src>
import jax
import jax.numpy as jnp
from jax.experimental import pallas as pl
from jax.experimental.pallas import tpu as pltpu

JITTER = 1e-6
_LANE = 128
_MAX_TILE = 2048  # keep (M, tn) live intermediates well inside the vreg file


def _round_up(x, m):
    return ((x + m - 1) // m) * m


# ----------------------------------------------------------------------------
# Fused forward kernel (one tile of N per grid step), transposed layout:
#   k     = exp(scale * (x - zx)^2)                (M, tN)
#   fused = A @ k,   A = [W^T ; Kinv]              (dim+M, tN)
#   mu    = fused[:dim]                            (dim, tN)
#   b     = fused[dim:]                            (M, tN)
#   var   = c0 - colsum(b * k),  c0 = 1+jit+noise  (1, tN)
#   out   = [mu ; var]                             (dim+1, tN)
# ----------------------------------------------------------------------------
def _fwd_kernel(params_ref, x_ref, zx_ref, a_ref, out_ref):
    scale = params_ref[0]                      # -0.5 / (length_scale + 0.001)
    c0 = params_ref[1]                         # 1.0 + JITTER + noise

    m = zx_ref.shape[0]
    dim = a_ref.shape[0] - m

    x = x_ref[...]                             # (1, tN)   lane-dense
    zx = zx_ref[...]                           # (M, 1)

    k = jnp.exp(scale * (x - zx) ** 2)         # (M, tN)

    # Single MXU dot produces both mu rows and b = Kinv @ k rows.
    fused = jnp.dot(a_ref[...], k,
                    preferred_element_type=jnp.float32)            # (dim+M, tN)
    mu = fused[:dim, :]                                            # (dim, tN)
    b = fused[dim:, :]                                             # (M, tN)

    var = c0 - jnp.sum(b * k, axis=0, keepdims=True)               # (1, tN)
    out_ref[...] = jnp.concatenate([mu, var], axis=0)              # (dim+1, tN)


# ----------------------------------------------------------------------------
# Parameter-only precompute (hoisted off the per-query hot path).
# ----------------------------------------------------------------------------
def gp_inducing_precompute(inducing_x, inducing_y, length_scale):
    zx = inducing_x.astype(jnp.float32)                        # (M, 1)
    zy = inducing_y.astype(jnp.float32)                        # (M, dim)
    M = zx.shape[0]
    scale = -0.5 / (jnp.asarray(length_scale, jnp.float32) + 0.001)

    # K_XX is tiny (M x M) -- plain jnp, no kernel launch.
    K_XX = jnp.exp(scale * (zx - zx.T) ** 2)
    # TODO(synk): torch.inverse has no in-kernel Pallas equivalent; a Cholesky
    # factor/solve in the JAX wrapper is used instead (numerically safer too).
    cho = jax.scipy.linalg.cho_factor(
        K_XX + JITTER * jnp.eye(M, dtype=jnp.float32))
    K_XX_inv = jax.scipy.linalg.cho_solve(cho, jnp.eye(M, dtype=jnp.float32))
    W_t = jax.scipy.linalg.cho_solve(cho, zy).T                # (dim, M)
    A = jnp.concatenate([W_t, K_XX_inv], axis=0)               # (dim+M, M)
    return zx, A, scale


# ----------------------------------------------------------------------------
# Forward from precomputed parameter-side quantities (single pallas_call).
# ----------------------------------------------------------------------------
def gp_inducing_forward_from_precomputed(X, zx, A, scale, noise,
                                         *, tile_n=_MAX_TILE):
    N = X.shape[0]
    M = zx.shape[0]
    dim = A.shape[0] - M

    # Lane-aligned tiling over N.  Keep >=2 tiles whenever N rounds to >=256
    # lanes so ("parallel",) can shard tiles across v7x's two TensorCores;
    # cap the tile at _MAX_TILE to avoid vreg spills of the (M, tn) temps.
    n_lane = _round_up(max(N, 1), _LANE)
    if n_lane >= 2 * _LANE:
        two_tile_cap = _round_up(max(n_lane // 2, _LANE), _LANE)
    else:
        two_tile_cap = n_lane
    tn = max(_LANE, min(tile_n, _MAX_TILE, two_tile_cap))
    n_pad = _round_up(n_lane, tn)
    grid = (n_pad // tn,)

    # Tail-only padding: no full zeros+scatter copy of X in HBM.
    x_row = X.astype(jnp.float32).reshape(1, N)
    if n_pad != N:
        x_row = jnp.pad(x_row, ((0, 0), (0, n_pad - N)))

    c0 = 1.0 + JITTER + jnp.asarray(noise, jnp.float32)
    params = jnp.stack([jnp.asarray(scale, jnp.float32), c0])   # (2,) in SMEM

    vmem = pltpu.MemorySpace.VMEM

    out_slab = pl.pallas_call(
        _fwd_kernel,
        out_shape=jax.ShapeDtypeStruct((dim + 1, n_pad), jnp.float32),
        grid=grid,
        in_specs=[
            pl.BlockSpec(memory_space=pltpu.MemorySpace.SMEM),              # params
            pl.BlockSpec((1, tn), lambda i: (0, i), memory_space=vmem),     # x
            pl.BlockSpec((M, 1), lambda i: (0, 0), memory_space=vmem),      # zx
            pl.BlockSpec((dim + M, M), lambda i: (0, 0),
                         memory_space=vmem),                                # A
        ],
        out_specs=pl.BlockSpec((dim + 1, tn), lambda i: (0, i),
                               memory_space=vmem),
        compiler_params=pltpu.CompilerParams(
            dimension_semantics=("parallel",),          # megacore on v7x
            vmem_limit_bytes=32 * 1024 * 1024,          # safe on v5e/v6e/v7x
        ),
    )(params, x_row, zx.astype(jnp.float32), A.astype(jnp.float32))

    mu_rows = out_slab[:dim, :N]
    if dim == 1:
        mu = mu_rows.reshape(N, 1)                       # avoid XLA transpose
    else:
        mu = mu_rows.T                                   # (N, dim)
    var = out_slab[dim, :N].reshape(N, 1)                # (N, 1)
    return mu, var


def gp_inducing_forward(X, inducing_x, inducing_y, length_scale, noise):
    """Equivalent of GP_InducingPoints.forward (returns mu, diag(sigma)[:, None])."""
    zx, A, scale = gp_inducing_precompute(inducing_x, inducing_y, length_scale)
    return gp_inducing_forward_from_precomputed(X, zx, A, scale, noise)


# ----------------------------------------------------------------------------
# Pure-JAX reference mirroring the PyTorch module exactly.
# ----------------------------------------------------------------------------
def _ref_forward(X, zx, zy, ls, noise):
    def kmat(a, b):
        return jnp.exp(-0.5 / (ls + 0.001) * (a - b.T) ** 2)

    K_XsX = kmat(X, zx)
    K_XX = kmat(zx, zx)
    K_XsXs = kmat(X, X)
    K_XX_inv = jnp.linalg.inv(K_XX + JITTER * jnp.eye(zx.shape[0]))
    mu = K_XsX @ K_XX_inv @ zy
    sigma = K_XsXs - K_XsX @ K_XX_inv @ K_XsX.T \
        + noise * jnp.eye(X.shape[0]) + JITTER * jnp.eye(X.shape[0])
    sigma = 0.5 * (sigma + sigma.T)
    return mu, jnp.diag(sigma)[:, None]


if __name__ == "__main__":
    key = jax.random.PRNGKey(0)
    k1, k2, k3, k4, k5 = jax.random.split(key, 5)

    # Deterministic "training data" used only to set the inducing-point range.
    N_data, M, dim = 32, 8, 1
    x_data = jax.random.uniform(k1, (N_data, 1), jnp.float32, -2.0, 2.0)

    # Parameter init mirroring __init__:
    inducing_base = jnp.linspace(x_data.min(), x_data.max(), M,
                                 dtype=jnp.float32).reshape(-1, 1)
    inducing_x = inducing_base + jnp.clip(
        jax.random.normal(k2, (M, 1), jnp.float32), -0.1, 0.1)
    inducing_y = jax.random.uniform(k3, (M, dim), jnp.float32, -0.5, 0.5)
    length_scale = jnp.float32(0.1)
    noise = jnp.float32(0.5)

    # Case 1: small query batch (single tile, heavy tail padding).
    N1 = 16
    X1 = jax.random.uniform(k4, (N1, 1), jnp.float32, -2.0, 2.0)
    mu1, var1 = gp_inducing_forward(X1, inducing_x, inducing_y, length_scale,
                                    noise)
    mu1 = jax.block_until_ready(mu1)
    var1 = jax.block_until_ready(var1)
    mu1_ref, var1_ref = _ref_forward(X1, inducing_x, inducing_y, length_scale,
                                     noise)
    assert mu1.shape == (N1, dim) and var1.shape == (N1, 1)
    assert jnp.allclose(mu1, mu1_ref, atol=1e-4, rtol=1e-4)
    assert jnp.allclose(var1, var1_ref, atol=1e-4, rtol=1e-4)

    # Case 2: multi-tile grid (exercises >=2 tiles + tail padding).
    N2 = 384
    X2 = jax.random.uniform(k5, (N2, 1), jnp.float32, -2.0, 2.0)
    mu2, var2 = gp_inducing_forward(X2, inducing_x, inducing_y, length_scale,
                                    noise)
    mu2 = jax.block_until_ready(mu2)
    var2 = jax.block_until_ready(var2)
    mu2_ref, var2_ref = _ref_forward(X2, inducing_x, inducing_y, length_scale,
                                     noise)
    assert mu2.shape == (N2, dim) and var2.shape == (N2, 1)
    assert jnp.allclose(mu2, mu2_ref, atol=1e-4, rtol=1e-4)
    assert jnp.allclose(var2, var2_ref, atol=1e-4, rtol=1e-4)

    print("KERNEL_OK")
</pallas_src>

<mosaic_0001>
module attributes {stable_mosaic.version = 11 : i64} {
  func.func @_fwd_kernel(%arg0: i32, %arg1: memref<2xf32, #tpu.memory_space<smem>>, %arg2: memref<1x128xf32, #tpu.memory_space<vmem>>, %arg3: memref<8x1xf32, #tpu.memory_space<vmem>>, %arg4: memref<9x8xf32, #tpu.memory_space<vmem>>, %arg5: memref<2x128xf32, #tpu.memory_space<vmem>>) attributes {dimension_semantics = [#tpu.dimension_semantics<parallel>], iteration_bounds = array<i64: 1>, scalar_prefetch = 0 : i64, scratch_operands = 0 : i64, tpu.core_type = #tpu.core_type<tc>, window_params = [{transform_indices = @transform_0, window_bounds = array<i64: 2>}, {transform_indices = @transform_1, window_bounds = array<i64: 1, 128>}, {pipeline_mode = #tpu.pipeline_mode<synchronous>, transform_indices = @transform_2, window_bounds = array<i64: 8, 1>}, {pipeline_mode = #tpu.pipeline_mode<synchronous>, transform_indices = @transform_3, window_bounds = array<i64: 9, 8>}, {transform_indices = @transform_4, window_bounds = array<i64: 2, 128>}]} {
    %c0 = arith.constant 0 : index
    %0 = memref.load %arg1[%c0] : memref<2xf32, #tpu.memory_space<smem>>
    %c1 = arith.constant 1 : index
    %1 = memref.load %arg1[%c1] : memref<2xf32, #tpu.memory_space<smem>>
    %c0_0 = arith.constant 0 : index
    %c0_1 = arith.constant 0 : index
    %2 = vector.load %arg2[%c0_0, %c0_1] : memref<1x128xf32, #tpu.memory_space<vmem>>, vector<1x128xf32>
    %c0_2 = arith.constant 0 : index
    %c0_3 = arith.constant 0 : index
    %3 = vector.load %arg3[%c0_2, %c0_3] : memref<8x1xf32, #tpu.memory_space<vmem>>, vector<8x1xf32>
    %4 = vector.broadcast %2 : vector<1x128xf32> to vector<8x128xf32>
    %5 = vector.broadcast %3 : vector<8x1xf32> to vector<8x128xf32>
    %6 = arith.subf %4, %5 : vector<8x128xf32>
    %7 = arith.mulf %6, %6 : vector<8x128xf32>
    %8 = vector.broadcast %0 : f32 to vector<8x128xf32>
    %9 = arith.mulf %8, %7 : vector<8x128xf32>
    %10 = math.exp %9 : vector<8x128xf32>
    %c0_4 = arith.constant 0 : index
    %c0_5 = arith.constant 0 : index
    %11 = vector.load %arg4[%c0_4, %c0_5] : memref<9x8xf32, #tpu.memory_space<vmem>>, vector<9x8xf32>
    %cst = arith.constant dense<0.000000e+00> : vector<9x128xf32>
    %12 = tpu.matmul %11, %10, %cst {dimension_numbers = #tpu.dot_dimension_numbers<[1], [0], [0], [1], [0, 0, 1, 1], [], []>} : vector<9x8xf32>, vector<8x128xf32>, vector<9x128xf32> -> vector<9x128xf32>
    %13 = vector.extract_strided_slice %12 {offsets = [0, 0], sizes = [1, 128], strides = [1, 1]} : vector<9x128xf32> to vector<1x128xf32>
    %14 = vector.extract_strided_slice %12 {offsets = [1, 0], sizes = [8, 128], strides = [1, 1]} : vector<9x128xf32> to vector<8x128xf32>
    %15 = arith.mulf %14, %10 : vector<8x128xf32>
    %cst_6 = arith.constant dense<0.000000e+00> : vector<128xf32>
    %16 = vector.multi_reduction <add>, %15, %cst_6 [0] : vector<8x128xf32> to vector<128xf32>
    %17 = vector.shape_cast %16 : vector<128xf32> to vector<1x128xf32>
    %18 = vector.broadcast %1 : f32 to vector<1x128xf32>
    %19 = arith.subf %18, %17 : vector<1x128xf32>
    %20 = tpu.concatenate %13, %19 in 0 : vector<1x128xf32>, vector<1x128xf32> -> vector<2x128xf32>
    %c0_7 = arith.constant 0 : index
    %c0_8 = arith.constant 0 : index
    %21 = vector.load %arg5[%c0_7, %c0_8] : memref<2x128xf32, #tpu.memory_space<vmem>>, vector<2x128xf32>
    tpu.vector_store %arg5[%c0_7, %c0_8], %20 {strides = array<i32>} : memref<2x128xf32, #tpu.memory_space<vmem>>, vector<2x128xf32>,
    return
  }
  func.func @transform_0(%arg0: i32) -> i32 {
    %c0_i32 = arith.constant 0 : i32
    %c0_i32_0 = arith.constant 0 : i32
    return %c0_i32 : i32
  }
  func.func @transform_1(%arg0: i32) -> (i32, i32) {
    %c0_i32 = arith.constant 0 : i32
    %c0_i32_0 = arith.constant 0 : i32
    return %c0_i32, %arg0 : i32, i32
  }
  func.func @transform_2(%arg0: i32) -> (i32, i32) {
    %c0_i32 = arith.constant 0 : i32
    %c0_i32_0 = arith.constant 0 : i32
    %c0_i32_1 = arith.constant 0 : i32
    return %c0_i32, %c0_i32_0 : i32, i32
  }
  func.func @transform_3(%arg0: i32) -> (i32, i32) {
    %c0_i32 = arith.constant 0 : i32
    %c0_i32_0 = arith.constant 0 : i32
    %c0_i32_1 = arith.constant 0 : i32
    return %c0_i32, %c0_i32_0 : i32, i32
  }
  func.func @transform_4(%arg0: i32) -> (i32, i32) {
    %c0_i32 = arith.constant 0 : i32
    %c0_i32_0 = arith.constant 0 : i32
    return %c0_i32, %arg0 : i32, i32
  }
}

</mosaic_0001>

<bundles_post_ra>
// kernel: tpu_custom_call.1
= control target key start
LH: loop header
LB: loop body
LE: loop exit
PB: predicated region body
PF: predicated region fallthrough
CT: control target
= control target key end

     0   :  { %9 = vsyncpa [#allocation4], 0  ;;  %s285_s0 = inlined_call_operand.vmem [shape: f32[2], index: 0, kind: input, shape index: {}]   ;;  %s286_s1 = inlined_call_operand.vmem [shape: f32[1,128], index: 1, kind: input, shape index: {}]   ;;  %s287_s2 = inlined_call_operand.vmem [shape: f32[8,1], index: 2, kind: input, shape index: {}]   ;;  %s288_s3 = inlined_call_operand.vmem [shape: f32[9,8], index: 3, kind: input, shape index: {}]   ;;  %s289_s4 = inlined_call_operand.hbm [shape: f32[2,128], index: 4, kind: output, shape index: {}]  }
   0x1   :  { %10 = vsyncpa [#allocation3], 0  ;;  %s17_s17 = sshll.u32 %s285_s0, 4  ;;  %s18_s17 = int_to_ptr.vmem [resolvable:$true] %s17_s17 }
   0x2   :  { %s192_s18 = scalar_lea.vmem %s18_s17, 16  ;;  %p197_p1 = scmp.lt.s32.totalorder %s18_s17, %s18_s17 }
   0x3   :  { %p193_p0 = scmp.ne.s32.totalorder %s18_s17, %s192_s18  ;;  %p198_p2 = scmp.lt.s32.totalorder %s192_s18, %s192_s18 }
   0x5   :  { %p199_p3 = por %p198_p2, %p197_p1 }
   0x7   :  { %p200_p4 = pnand %p199_p3, %p193_p0 }
   0x9   :  { %203 = shalt.err (!%p200_p4)
}
   0xa   :  { %s230_s19 = smov [#allocation2]  }
   0xb   :  { %20 = dma.vmem_to_smem %s18_s17, 16, %s230_s19, [#allocation4]  }
   0xc   :  { %226 = dma.done.wait [#allocation4], 16  }
   0xd   :  { %227 = vsyncadd [#allocation4], 4294967280 }
   0xe   :  { %30 = sfence }
   0xf   :  { %v34_v0 = vld [vmem:[%s287_s2] sm:$0xff]  ;;  %v231_v1 = vmov 0   ;;  %vm54_vm0 = vcmask 64512   ;;  %s31_s23 = sld [smem:[#allocation2]]  ;;  %v53_v11 = vld [vmem:[%s288_s3 + $0x8] sm:$0x1] }
  0x10   :  { %189 = vset.pattern.permute.xlu0 %v231_v1  ;;  %v52_v2 = vld [vmem:[%s288_s3] sm:$0xff]  ;;  %vm143_vm1 = vcmask 1046528   ;;  %s232_s3 = smov [#allocation5]   ;;  %vm156_vm2 = vcmask 1040384  }
  0x11   :  { %43 = vperm.xlu0 %189, %v34_v0   ;;  %183 = vmatprep.mubr.msk.f32.mxu0 %vm54_vm0, %v52_v2  ;;  %v175_v3 = vld [vmem:[%s286_s1] ss:$0 sm:$0xff]  ;;  %s174_s1 = sld [smem:[#allocation2 + $0x1]]  ;;  %s165_s27 = sshll.u32 %s232_s3, 4  ;;  %s166_s27 = int_to_ptr.vmem [resolvable:$true] %s165_s27 }
  0x12   :  { %s204_s28 = scalar_lea.vmem %s166_s27, 32  ;;  %p209_p6 = scmp.lt.s32.totalorder %s166_s27, %s166_s27 }
  0x13   :  { %p205_p5 = scmp.ne.s32.totalorder %s166_s27, %s204_s28  ;;  %p210_p7 = scmp.lt.s32.totalorder %s204_s28, %s204_s28 }
  0x15   :  { %v48_v6 = vstv %s31_s23  ;;  %p211_p8 = por %p210_p7, %p209_p6 }
  0x17   :  { %v154_v25 = vstv %s174_s1  ;;  %p212_p9 = pnand %p211_p8, %p205_p5 }
  0x90   :  { %v44_v4 = vpop.permute.xlu0 %43 }
  0x91   :  { %v46_v5 = vsub.f32 %v175_v3, %v44_v4 }
  0x93   :  { %v47_v7 = vmul.f32 %v46_v5, %v46_v5 }
  0x95   :  { %v49_v8 = vmul.f32 %v48_v6, %v47_v7 }
  0x97   :  { %v50_v9 = vmul.f32 1.442695, %v49_v8 }
  0x99   :  { %190 = vpow2.f32 %v50_v9 }
  0xa3   :  { %v191_v10 = vpop.eup %190 }
  0xa4   :  { %181 = vmatprep.subr.mxu0 %v191_v10  ;;  %v137_v12 = vrot.slane %v191_v10, 7 }
  0xa5   :  { %182 = vmatpush3.msra.mxu0 %v191_v10 }
  0xa6   :  { %184 = vmatmul.mubr.msk.f32.vlgmr.msra.gmra.mrb[0].mxu0 %vm54_vm0, %v53_v11 }
 0x179   :  { %v185_v13 = vpop.f32.mrb[0].mxu0 }
 0x17a   :  { %v140_v14 = vmul.f32 %v185_v13, %v137_v12  ;;  %v127_v15 = vpop.f32.mrb[1].mxu0 }
 0x17b   :  { %v139_v16 = vmul.f32 %v137_v12, %v127_v15 }
 0x17c   :  { %v145_v17 = vrot.slane %v140_v14, 1 }
 0x17d   :  { %v144_v18 = vrot.slane %v139_v16, 1 }
 0x17f   :  { %v146_v19 = vsel %vm143_vm1, %v144_v18, %v145_v17 }
 0x180   :  { %v148_v20 = vrot.slane %v146_v19, 4 }
 0x182   :  { %v149_v21 = vadd.f32 %v148_v20, %v146_v19 }
 0x184   :  { %v150_v22 = vrot.slane %v149_v21, 2 }
 0x186   :  { %v151_v23 = vadd.f32 %v150_v22, %v149_v21 }
 0x188   :  { %v152_v24 = vrot.slane %v151_v23, 1 }
 0x18a   :  { %v153_v26 = vadd.f32 %v152_v24, %v151_v23 }
 0x18c   :  { %v155_v27 = vsub.f32 %v154_v25, %v153_v26 }
 0x18e   :  { %v157_v28 = vsel %vm156_vm2, %v127_v15, %v155_v27 }
 0x18f   :  { %158 = vst [vmem:[#allocation5] sm:$0x3] %v157_v28 }
 0x190   :  { %215 = shalt.err (!%p212_p9)
}
 0x191   :  { %s216_s5 = scalar_lea.hbm %s289_s4, 32 }
 0x192   :  { %p217_p10 = scmp.ne.s32.totalorder %s289_s4, %s216_s5  ;;  %p220_p11 = scmp.lt.u32.totalorder %s216_s5, %s289_s4 }
 0x194   :  { %p222_p12 = pnand %p220_p11, %p217_p10 }
 0x196   :  { %225 = shalt.err (!%p222_p12)
}
 0x197   :  { %168 = dma.vmem_to_hbm [thread:$0]  %s166_s27, 32, %s289_s4, [#allocation3]  }
 0x198   :  { %228 = dma.done.wait [#allocation3], 32  }
 0x199   :  { %229 = vsyncadd [#allocation3], 4294967264 }
 0x19a   :  { %172 = vsyncpa [#allocation3], 1 }
 0x19b   :  { %173 = vsyncpa [#allocation4], 1 }

</bundles_post_ra>
